<compile_context>
chip_gen: v5e
topology: v5e:2x2
jax: 0.10.0
libtpu: 0.0.40
codegen_flags: <defaults>
</compile_context>

<pallas_src>
import functools

import jax
import jax.numpy as jnp
from jax.experimental import pallas as pl
from jax.experimental.pallas import tpu as pltpu


@functools.lru_cache(maxsize=None)
def _vmem_limit_bytes():
    """Per-generation scoped-VMEM limit: ~75% of physical (96MiB v5e/v6e, 48MiB v7x)."""
    try:
        cap = int(pltpu.get_tpu_info().vmem_capacity_bytes)
    except Exception:
        cap = 64 * 1024 * 1024
    return max(32 * 1024 * 1024, (cap * 3) // 4)


def _pick_tile(dim, pref, align):
    """Largest t <= pref with dim % t == 0 and t a multiple of `align` (else full dim)."""
    if dim <= pref:
        return dim
    t = (pref // align) * align
    while t >= align:
        if dim % t == 0:
            return t
        t -= align
    return dim  # TODO(synk): pad + masked tail tile instead of a full-extent block


# ----------------------------- one-pass linear kernels --------------------- #
def _linear_kernel(x_ref, w_ref, o_ref):
    o_ref[...] = jnp.dot(x_ref[...], w_ref[...],
                         preferred_element_type=jnp.float32).astype(o_ref.dtype)


def _linear_bias_kernel(x_ref, w_ref, b_ref, o_ref):
    acc = jnp.dot(x_ref[...], w_ref[...], preferred_element_type=jnp.float32)
    o_ref[...] = (acc + b_ref[...]).astype(o_ref.dtype)


def linear(x2d, w, b=None, *, out_dtype=None, tm_pref=256, tn_pref=512):
    """x2d: (M, K), w: (K, Nout), b: (Nout,) or None -> (M, Nout).

    MXU operands are cast to bf16; accumulation is f32.  K is taken whole
    (single-pass, no accumulator revisits) - fine for transformer channel dims.
    """
    M, K = x2d.shape
    Nout = w.shape[1]
    out_dtype = out_dtype or x2d.dtype

    xb = x2d.astype(jnp.bfloat16)
    wb = w.astype(jnp.bfloat16)

    tm = _pick_tile(M, tm_pref, 8)
    tn = _pick_tile(Nout, tn_pref, 128)
    grid = (M // tm, Nout // tn)

    x_spec = pl.BlockSpec((tm, K), lambda i, j: (i, 0))
    w_spec = pl.BlockSpec((K, tn), lambda i, j: (0, j))
    o_spec = pl.BlockSpec((tm, tn), lambda i, j: (i, j))

    cost = pl.CostEstimate(
        flops=2 * M * K * Nout,
        transcendentals=0,
        bytes_accessed=2 * (M * K + K * Nout) + M * Nout * jnp.dtype(out_dtype).itemsize,
    )
    cparams = pltpu.CompilerParams(
        dimension_semantics=("parallel", "parallel"),
        vmem_limit_bytes=_vmem_limit_bytes(),
    )

    if b is None:
        return pl.pallas_call(
            _linear_kernel,
            out_shape=jax.ShapeDtypeStruct((M, Nout), out_dtype),
            grid_spec=pltpu.PrefetchScalarGridSpec(
                num_scalar_prefetch=0, grid=grid,
                in_specs=[x_spec, w_spec],
                out_specs=o_spec),
            compiler_params=cparams,
            cost_estimate=cost,
        )(xb, wb)

    b_spec = pl.BlockSpec((1, tn), lambda i, j: (0, j))
    return pl.pallas_call(
        _linear_bias_kernel,
        out_shape=jax.ShapeDtypeStruct((M, Nout), out_dtype),
        grid_spec=pltpu.PrefetchScalarGridSpec(
            num_scalar_prefetch=0, grid=grid,
            in_specs=[x_spec, w_spec, b_spec],
            out_specs=o_spec),
        compiler_params=cparams,
        cost_estimate=cost,
    )(xb, wb, b.astype(jnp.float32).reshape(1, Nout))


# ------------------ head-in-grid flash-style attention kernel -------------- #
def _flash_attn_kernel(q_ref, k_ref, v_ref, o_ref, m_sc, l_sc, acc_sc):
    ki = pl.program_id(3)

    @pl.when(ki == 0)
    def _():
        m_sc[...] = jnp.full_like(m_sc, -jnp.inf)
        l_sc[...] = jnp.zeros_like(l_sc)
        acc_sc[...] = jnp.zeros_like(acc_sc)

    q = q_ref[0, 0]                 # (tq, hd) bf16; 1/sqrt(hd) folded into Wq
    k = k_ref[0, 0]                 # (tk, hd) bf16
    v = v_ref[0, 0]                 # (tk, hd) bf16

    # QK^T on the MXU (contract hd, no explicit transpose), f32 accumulate.
    s = jax.lax.dot_general(q, k, (((1,), (1,)), ((), ())),
                            preferred_element_type=jnp.float32)   # (tq, tk) f32

    # Online softmax; all statistics kept in f32 (v5e-safe VPU/EUP path).
    m_prev = m_sc[...]
    m_new = jnp.maximum(m_prev, jnp.max(s, axis=-1, keepdims=True))
    alpha = jnp.exp(m_prev - m_new)
    p = jnp.exp(s - m_new)
    l_sc[...] = alpha * l_sc[...] + jnp.sum(p, axis=-1, keepdims=True)
    acc_sc[...] = alpha * acc_sc[...] + jnp.dot(
        p.astype(v.dtype), v, preferred_element_type=jnp.float32)
    m_sc[...] = m_new

    @pl.when(ki == pl.num_programs(3) - 1)
    def _():
        # Exact normalization (epilogue runs once per q tile; approx recip not needed).
        o_ref[0, 0] = (acc_sc[...] / l_sc[...]).astype(o_ref.dtype)


def mha_flash(q, k, v, *, tq_pref=256, tk_pref=512):
    """q, k, v: (B, H, N, hd) bf16 -> (B, H, N, hd) bf16."""
    B, H, N, hd = q.shape
    tq = _pick_tile(N, tq_pref, 8)
    tk = _pick_tile(N, tk_pref, 8)
    grid = (B, H, N // tq, N // tk)

    q_spec = pl.BlockSpec((1, 1, tq, hd), lambda b, h, qi, ki: (b, h, qi, 0))
    kv_spec = pl.BlockSpec((1, 1, tk, hd), lambda b, h, qi, ki: (b, h, ki, 0))
    o_spec = pl.BlockSpec((1, 1, tq, hd), lambda b, h, qi, ki: (b, h, qi, 0))

    itemsize = jnp.dtype(q.dtype).itemsize
    cost = pl.CostEstimate(
        flops=4 * B * H * N * N * hd,        # QK^T + PV
        transcendentals=B * H * N * N,       # exp
        bytes_accessed=4 * B * H * N * hd * itemsize,
    )

    return pl.pallas_call(
        _flash_attn_kernel,
        out_shape=jax.ShapeDtypeStruct((B, H, N, hd), q.dtype),
        grid_spec=pltpu.PrefetchScalarGridSpec(
            num_scalar_prefetch=0,
            grid=grid,
            in_specs=[q_spec, kv_spec, kv_spec],
            out_specs=o_spec,
            scratch_shapes=[
                pltpu.VMEM((tq, 1), jnp.float32),    # m (running max)
                pltpu.VMEM((tq, 1), jnp.float32),    # l (running denom)
                pltpu.VMEM((tq, hd), jnp.float32),   # acc
            ],
        ),
        compiler_params=pltpu.CompilerParams(
            dimension_semantics=("parallel", "parallel", "parallel", "arbitrary"),
            vmem_limit_bytes=_vmem_limit_bytes(),
        ),
        cost_estimate=cost,
    )(q, k, v)


# --------------------------------- module ---------------------------------- #
def attention_forward(x, params, num_heads):
    """Pallas equivalent of Attention.forward. x: (B, N, C) float32."""
    B, N, C = x.shape
    head_dim = C // num_heads
    scale = head_dim ** (-0.5)

    # Fold 1/sqrt(head_dim) into the q-columns of w_qkv (weight-only op; in a
    # real model this would be baked once at parameter-load time).
    w_qkv = params["w_qkv"]
    w_qkv = jnp.concatenate([w_qkv[:, :C] * scale, w_qkv[:, C:]], axis=1)

    x2d = x.reshape(B * N, C)

    # qkv = Linear(C, 3C, bias=False); bf16 output halves intermediate HBM traffic.
    qkv = linear(x2d, w_qkv, None, out_dtype=jnp.bfloat16)        # (B*N, 3C) bf16
    qkv = qkv.reshape(B, N, 3, num_heads, head_dim)
    qkv = jnp.transpose(qkv, (2, 0, 3, 1, 4))                     # (3, B, H, N, hd)
    q, k, v = qkv[0], qkv[1], qkv[2]

    o = mha_flash(q, k, v)                                        # (B, H, N, hd) bf16
    o = jnp.transpose(o, (0, 2, 1, 3)).reshape(B * N, C)

    # proj = Linear(C, C) with bias; output back in the input dtype.
    out = linear(o, params["w_proj"], params["b_proj"], out_dtype=x.dtype)
    return out.reshape(B, N, C)


def reference_forward(x, params, num_heads):
    B, N, C = x.shape
    hd = C // num_heads
    scale = hd ** (-0.5)
    qkv = x @ params["w_qkv"]                                     # qkv_bias=False
    qkv = qkv.reshape(B, N, 3, num_heads, hd).transpose(2, 0, 3, 1, 4)
    q, k, v = qkv[0], qkv[1], qkv[2]
    attn = jnp.einsum("bhqd,bhkd->bhqk", q, k) * scale
    attn = jax.nn.softmax(attn, axis=-1)
    o = jnp.einsum("bhqk,bhkd->bhqd", attn, v)
    o = o.transpose(0, 2, 1, 3).reshape(B, N, C)
    return o @ params["w_proj"] + params["b_proj"]


def init_params(key, dim, num_heads):
    k1, k2, k3 = jax.random.split(key, 3)
    bound = 1.0 / (dim ** 0.5)
    # weights stored as (in_features, out_features) so kernels do x @ W
    w_qkv = jax.random.uniform(k1, (dim, 3 * dim), jnp.float32, -bound, bound)
    w_proj = jax.random.uniform(k2, (dim, dim), jnp.float32, -bound, bound)
    b_proj = jax.random.uniform(k3, (dim,), jnp.float32, -bound, bound)
    return {"w_qkv": w_qkv, "w_proj": w_proj, "b_proj": b_proj}


if __name__ == "__main__":
    B, N, C, H = 2, 8, 32, 8     # batch, seq, dim, num_heads (head_dim = 4)
    key = jax.random.PRNGKey(0)
    kx, kp = jax.random.split(key)
    x = jax.random.normal(kx, (B, N, C), jnp.float32)
    params = init_params(kp, C, H)

    out = attention_forward(x, params, H)
    out = jax.block_until_ready(out)

    ref = reference_forward(x, params, H)
    assert out.shape == (B, N, C)
    # Tolerance accounts for bf16 MXU operands (f32 accumulation) vs f32 reference.
    assert jnp.allclose(out, ref, atol=3e-2, rtol=3e-2), "mismatch vs reference"

    # attn_drop / proj_drop are nn.Dropout(0.0) -> identity, omitted.
    print("KERNEL_OK")
</pallas_src>

<mosaic_0001>
module attributes {stable_mosaic.version = 11 : i64} {
  func.func @_linear_kernel(%arg0: i32, %arg1: i32, %arg2: memref<16x32xbf16, #tpu.memory_space<vmem>>, %arg3: memref<32x96xbf16, #tpu.memory_space<vmem>>, %arg4: memref<16x96xbf16, #tpu.memory_space<vmem>>) attributes {dimension_semantics = [#tpu.dimension_semantics<parallel>, #tpu.dimension_semantics<parallel>], iteration_bounds = array<i64: 1, 1>, scalar_prefetch = 0 : i64, scratch_operands = 0 : i64, tpu.core_type = #tpu.core_type<tc>, window_params = [{transform_indices = @transform_0, window_bounds = array<i64: 16, 32>}, {transform_indices = @transform_1, window_bounds = array<i64: 32, 96>}, {transform_indices = @transform_2, window_bounds = array<i64: 16, 96>}]} {
    %c0 = arith.constant 0 : index
    %c0_0 = arith.constant 0 : index
    %0 = vector.load %arg2[%c0, %c0_0] : memref<16x32xbf16, #tpu.memory_space<vmem>>, vector<16x32xbf16>
    %c0_1 = arith.constant 0 : index
    %c0_2 = arith.constant 0 : index
    %1 = vector.load %arg3[%c0_1, %c0_2] : memref<32x96xbf16, #tpu.memory_space<vmem>>, vector<32x96xbf16>
    %cst = arith.constant dense<0.000000e+00> : vector<16x96xf32>
    %2 = tpu.matmul %0, %1, %cst {dimension_numbers = #tpu.dot_dimension_numbers<[1], [0], [0], [1], [0, 0, 1, 1], [], []>} : vector<16x32xbf16>, vector<32x96xbf16>, vector<16x96xf32> -> vector<16x96xf32>
    %3 = arith.truncf %2 : vector<16x96xf32> to vector<16x96xbf16>
    %c0_3 = arith.constant 0 : index
    %c0_4 = arith.constant 0 : index
    %4 = vector.load %arg4[%c0_3, %c0_4] : memref<16x96xbf16, #tpu.memory_space<vmem>>, vector<16x96xbf16>
    tpu.vector_store %arg4[%c0_3, %c0_4], %3 {strides = array<i32>} : memref<16x96xbf16, #tpu.memory_space<vmem>>, vector<16x96xbf16>,
    return
  }
  func.func @transform_0(%arg0: i32, %arg1: i32) -> (i32, i32) {
    %c0_i32 = arith.constant 0 : i32
    %c0_i32_0 = arith.constant 0 : i32
    return %arg0, %c0_i32 : i32, i32
  }
  func.func @transform_1(%arg0: i32, %arg1: i32) -> (i32, i32) {
    %c0_i32 = arith.constant 0 : i32
    %c0_i32_0 = arith.constant 0 : i32
    return %c0_i32, %arg1 : i32, i32
  }
  func.func @transform_2(%arg0: i32, %arg1: i32) -> (i32, i32) {
    %c0_i32 = arith.constant 0 : i32
    return %arg0, %arg1 : i32, i32
  }
}

</mosaic_0001>

<bundles_post_ra>
// kernel: tpu_custom_call.1
= control target key start
LH: loop header
LB: loop body
LE: loop exit
PB: predicated region body
PF: predicated region fallthrough
CT: control target
= control target key end

     0   :  { %7 = vsyncpa [#allocation3], 0  ;;  %s248_s0 = inlined_call_operand.hbm [shape: bf16[16,32], index: 0, kind: input, shape index: {}]   ;;  %s249_s1 = inlined_call_operand.hbm [shape: bf16[32,96], index: 1, kind: input, shape index: {}]   ;;  %s250_s2 = inlined_call_operand.hbm [shape: bf16[16,96], index: 2, kind: output, shape index: {}]  }
   0x1   :  { %8 = vsyncpa [#allocation6], 0 }
   0x2   :  { %9 = vsyncpa [#allocation4], 0  ;;  %s14_s11 = sshll.u32 %s248_s0, 4  ;;  %s210_s12 = smov [#allocation2]   ;;  %s15_s11 = int_to_ptr.hbm [resolvable:$true] %s14_s11 }
   0x3   :  { %s16_s13 = sshll.u32 %s210_s12, 4  ;;  %s27_s16 = sshll.u32 %s249_s1, 4  ;;  %s17_s13 = int_to_ptr.vmem [resolvable:$true] %s16_s13  ;;  %s28_s16 = int_to_ptr.hbm [resolvable:$true] %s27_s16 }
   0x4   :  { %s211_s17 = smov 64   ;;  %s212_s18 = smov 4  }
   0x5   :  { %22 = dma.hbm_to_vmem [thread:$0]  %s15_s11, 128, %s17_s13, [#allocation3], %s211_s17, %s211_s17, %s212_s18  }
   0x6   :  { %s213_s19 = smov [#allocation5]  }
   0x7   :  { %s29_s20 = sshll.u32 %s213_s19, 4  ;;  %s30_s20 = int_to_ptr.vmem [resolvable:$true] %s29_s20 }
   0x8   :  { %35 = dma.hbm_to_vmem [thread:$0]  %s28_s16, 256, %s30_s20, [#allocation6], %s211_s17, %s211_s17, %s212_s18  }
   0x9   :  { %204 = dma.done.wait [#allocation3], 128  }
   0xa   :  { %205 = vsyncadd [#allocation3], 4294967168 }
   0xb   :  { %206 = dma.done.wait [#allocation6], 256  }
   0xc   :  { %207 = vsyncadd [#allocation6], 4294967040  ;;  %v126_v0 = vld [vmem:[#allocation5 + $0x8] sm:$0xff]  ;;  %v125_v1 = vld [vmem:[#allocation5] sm:$0xff]  ;;  %vm68_vm0 = vcmask 261120   ;;  %vm88_vm1 = vcmask 781312  }
   0xd   :  { %78 = vmatpush.bf16.msra.mxu0 %v126_v0  ;;  %v124_v2 = vld [vmem:[#allocation2] sm:$0xff]  ;;  %s214_s0 = smov [#allocation7]   ;;  %s97_s23 = sshll.u32 %s250_s2, 4  ;;  %s98_s23 = int_to_ptr.hbm [resolvable:$true] %s97_s23 }
   0xe   :  { %s95_s1 = sshll.u32 %s214_s0, 4  ;;  %s96_s1 = int_to_ptr.vmem [resolvable:$true] %s95_s1 }
  0x11   :  { %79 = vmatpush.bf16.msra.mxu0 %v125_v1 }
  0x14   :  { %123 = vmatmul.msk.bf16.vlgmr.msra.gmra.mxu0 %vm68_vm0, %v124_v2 }
  0x91   :  { %v81_v3 = vpop.f32.mrf.mxu0 }
  0x92   :  { %v86_v4 = vpack.c.bf16 %v81_v3, %v81_v3 }
  0x94   :  { %89 = vst.msk [vmem:[#allocation7] sm:$0xf] %vm88_vm1, %v86_v4 }
  0x99   :  { %v83_v5 = vpop.f32.mrf.mxu0 }
  0x9a   :  { %v87_v6 = vpack.c.bf16 %v83_v5, %v83_v5 }
  0x9c   :  { %90 = vst.msk [vmem:[#allocation7 + $0x4] sm:$0xf] %vm88_vm1, %v87_v6 }
  0x9d   :  { %103 = dma.vmem_to_hbm [thread:$0]  %s96_s1, 128, %s98_s23, [#allocation4], %s211_s17, %s211_s17, %s212_s18  }
  0x9e   :  { %208 = dma.done.wait [#allocation4], 128  }
  0x9f   :  { %209 = vsyncadd [#allocation4], 4294967168 }
  0xa0   :  { %108 = vsyncpa [#allocation3], 1 }
  0xa1   :  { %109 = vsyncpa [#allocation6], 1 }
  0xa2   :  { %110 = vsyncpa [#allocation4], 1 }

</bundles_post_ra>
